<compile_context>
chip_gen: v5e
topology: v5e:2x2
jax: 0.10.0
libtpu: 0.0.40
codegen_flags: <defaults>
</compile_context>

<pallas_src>
import functools
import math

import jax
import jax.numpy as jnp
from jax.experimental import pallas as pl
from jax.experimental.pallas import tpu as pltpu


def _choose_tile_rows(H, W):
    """Image rows per grid step (TH).

    Prefer a proper divisor of H so there are >= 2 grid steps per image (halo
    path active, both v7x cores engaged, pipeline can prefetch), with
    TM = TH * W a multiple of 16 (bf16 sublane tile) and <= 512 rows."""
    for th in range(H - 1, 0, -1):
        if H % th == 0 and (th * W) % 16 == 0 and th * W <= 512:
            return th
    return H


# ----------------------------------------------------------------------------
# Fused kernel:
#   conv1(1x1)+BN+ReLU -> deconv2(3x3,s=2,p=1,op=1)+BN+ReLU -> conv3(1x1)+BN+ReLU
# Activations between the dots stay in VMEM; accumulation is f32 on the MXU.
# ----------------------------------------------------------------------------
def _decoder_block_kernel(x_ref, xh_ref, w1_ref, b1_ref, w2_ref, b2_ref,
                          w3_ref, b3_ref, o_ref, *, W, tiles_per_image):
    TM = x_ref.shape[0]              # = TH * W flattened (h, w) rows
    mid = w1_ref.shape[1]

    # --- conv1 (1x1) + BN1 + ReLU (f32 accumulate, bf16 activation) ----------
    y = jnp.dot(x_ref[...], w1_ref[...], preferred_element_type=jnp.float32)
    y = jnp.maximum(y + b1_ref[...], 0.0).astype(jnp.bfloat16)

    # conv1 on the halo row (first image row of the next tile); it supplies the
    # h+1 taps of this tile's last row.  Zero it when this tile ends at the
    # bottom of its image (transpose-conv implicitly zero-pads its input map).
    yh = jnp.dot(xh_ref[...], w1_ref[...], preferred_element_type=jnp.float32)
    yh = jnp.maximum(yh + b1_ref[...], 0.0).astype(jnp.bfloat16)
    is_last = ((pl.program_id(0) + 1) % tiles_per_image) == 0
    yh = yh * jnp.where(is_last, 0.0, 1.0).astype(jnp.bfloat16)

    # --- build the 4 sub-pixel taps in VMEM (no HBM `cols` blowup) -----------
    # rows of y_ext: [tile rows | halo row | zero pad]; flat index i = h*W + w
    y_ext = jnp.concatenate([y, yh, jnp.zeros((8, mid), jnp.bfloat16)], axis=0)
    keep_w = (jax.lax.broadcasted_iota(jnp.int32, (TM, 1), 0) % W) != (W - 1)
    t00 = y                                                  # y[h,   w  ]
    t01 = jnp.where(keep_w, y_ext[1:TM + 1], 0.0)            # y[h,   w+1]
    t10 = y_ext[W:TM + W]                                    # y[h+1, w  ]
    t11 = jnp.where(keep_w, y_ext[W + 1:TM + W + 1], 0.0)    # y[h+1, w+1]
    cols = jnp.concatenate([t00, t01, t10, t11], axis=-1)    # (TM, 4*mid)

    # --- deconv2 as a single sub-pixel phase matmul + BN2 + ReLU -------------
    d = jnp.dot(cols, w2_ref[...], preferred_element_type=jnp.float32)
    d = jnp.maximum(d + b2_ref[...], 0.0)                    # f32 (TM, 4*mid)

    # --- conv3 (1x1) as a per-phase block-diagonal epilogue dot + BN3 + ReLU -
    out = jnp.dot(d.astype(jnp.bfloat16), w3_ref[...],
                  preferred_element_type=jnp.float32)
    out = jnp.maximum(out + b3_ref[...], 0.0)                # (TM, 4*nf)
    o_ref[...] = out.astype(o_ref.dtype)


def decoder_block_forward(params, x_nchw):
    """x: (B, Cin, H, W) f32 NCHW -> (B, n_filters, 2H, 2W) f32 NCHW."""
    B, Cin, H, W = x_nchw.shape
    mid = params["w1"].shape[1]
    nf = params["w3"].shape[1] // 4
    assert Cin == params["w1"].shape[0]
    assert W % 8 == 0, "image width must be a multiple of 8 for row tiling"

    TH = _choose_tile_rows(H, W)
    TM = TH * W
    n_tiles = (B * H) // TH
    tiles_per_image = H // TH

    # single layout pass in: NCHW -> flattened NHWC rows, cast to bf16
    x_rows = jnp.transpose(x_nchw, (0, 2, 3, 1)).reshape(B * H * W, Cin)
    x_rows = x_rows.astype(jnp.bfloat16)

    kernel = functools.partial(_decoder_block_kernel, W=W,
                               tiles_per_image=tiles_per_image)
    flops = 2 * B * H * W * (Cin * mid + (4 * mid) * (4 * mid)
                             + (4 * mid) * (4 * nf))
    out = pl.pallas_call(
        kernel,
        out_shape=jax.ShapeDtypeStruct((B * H * W, 4 * nf), jnp.bfloat16),
        grid=(n_tiles,),
        in_specs=[
            pl.BlockSpec((TM, Cin), lambda j: (j, 0)),            # main rows
            pl.BlockSpec((W, Cin),                                # halo row
                         lambda j: (jnp.minimum((j + 1) * TH, B * H - 1), 0)),
            pl.BlockSpec((Cin, mid), lambda j: (0, 0)),           # w1
            pl.BlockSpec((1, mid), lambda j: (0, 0)),             # b1
            pl.BlockSpec((4 * mid, 4 * mid), lambda j: (0, 0)),   # w2 (phase)
            pl.BlockSpec((1, 4 * mid), lambda j: (0, 0)),         # b2
            pl.BlockSpec((4 * mid, 4 * nf), lambda j: (0, 0)),    # w3 blockdiag
            pl.BlockSpec((1, 4 * nf), lambda j: (0, 0)),          # b3
        ],
        out_specs=pl.BlockSpec((TM, 4 * nf), lambda j: (j, 0)),
        compiler_params=pltpu.CompilerParams(
            dimension_semantics=("parallel",)),
        cost_estimate=pl.CostEstimate(
            flops=flops, transcendentals=0,
            bytes_accessed=B * H * W * (2 * Cin + 2 * 4 * nf)),
    )(x_rows, x_rows, params["w1"], params["b1"], params["w2"], params["b2"],
      params["w3"], params["b3"])

    # single layout pass out: pixel-shuffle + NHWC->NCHW + f32 cast
    out = out.reshape(B, H, W, 2, 2, nf)
    out = jnp.transpose(out, (0, 5, 1, 3, 2, 4)).astype(jnp.float32)
    return out.reshape(B, nf, 2 * H, 2 * W)


# ----------------------------------------------------------------------------
# Sub-pixel (phase) weight for ConvTranspose2d(k=3, s=2, p=1, output_padding=1)
# ----------------------------------------------------------------------------
def _deconv_phase_weight(wd):
    """wd: (3,3,Cin,Cout) HWIO transpose-conv weight (BN scale folded).

    Returns (4*Cin, 4*Cout); row blocks = taps [t00,t01,t10,t11],
    column blocks = output phases [(0,0),(0,1),(1,0),(1,1)]."""
    cin, cout = wd.shape[2], wd.shape[3]
    Z = jnp.zeros((cin, cout), wd.dtype)
    Wk = lambda kh, kw: wd[kh, kw]
    col0 = jnp.concatenate([Wk(1, 1), Z,        Z,        Z], axis=0)
    col1 = jnp.concatenate([Wk(1, 2), Wk(1, 0), Z,        Z], axis=0)
    col2 = jnp.concatenate([Wk(2, 1), Z,        Wk(0, 1), Z], axis=0)
    col3 = jnp.concatenate([Wk(2, 2), Wk(2, 0), Wk(0, 2), Wk(0, 0)], axis=0)
    return jnp.concatenate([col0, col1, col2, col3], axis=1)


# ----------------------------------------------------------------------------
# Parameters (PyTorch layouts) + folding into kernel-ready form
# ----------------------------------------------------------------------------
def build_params(key, in_channels, n_filters):
    mid = in_channels // 4
    keys = iter(jax.random.split(key, 32))

    def bn_params(c):
        return (1.0 + 0.1 * jax.random.normal(next(keys), (c,), jnp.float32),   # gamma
                0.1 * jax.random.normal(next(keys), (c,), jnp.float32),         # beta
                0.1 * jax.random.normal(next(keys), (c,), jnp.float32),         # running mean
                0.9 + 0.2 * jax.random.uniform(next(keys), (c,), jnp.float32))  # running var

    raw = {
        "conv1_w": jax.random.normal(next(keys), (mid, in_channels, 1, 1),
                                     jnp.float32) / math.sqrt(in_channels),
        "conv1_b": 0.1 * jax.random.normal(next(keys), (mid,), jnp.float32),
        "bn1": bn_params(mid),
        # ConvTranspose2d weight layout: (Cin, Cout, kh, kw)
        "deconv2_w": jax.random.normal(next(keys), (mid, mid, 3, 3),
                                       jnp.float32) / math.sqrt(mid * 9),
        "deconv2_b": 0.1 * jax.random.normal(next(keys), (mid,), jnp.float32),
        "bn2": bn_params(mid),
        "conv3_w": jax.random.normal(next(keys), (n_filters, mid, 1, 1),
                                     jnp.float32) / math.sqrt(mid),
        "conv3_b": 0.1 * jax.random.normal(next(keys), (n_filters,), jnp.float32),
        "bn3": bn_params(n_filters),
    }
    return raw, fold_params(raw)


def fold_params(raw):
    """Fold eval-mode BN (+conv bias) into matmul weights / per-channel shifts."""
    eps = 1e-5

    def bn_fold(g, b, m, v):
        s = g / jnp.sqrt(v + eps)
        return s, b - m * s

    s1, sh1 = bn_fold(*raw["bn1"])
    w1 = jnp.transpose(raw["conv1_w"][:, :, 0, 0], (1, 0)) * s1[None, :]
    b1 = sh1 + raw["conv1_b"] * s1

    s2, sh2 = bn_fold(*raw["bn2"])
    wd = jnp.transpose(raw["deconv2_w"], (2, 3, 0, 1)) * s2[None, None, None, :]
    w2 = _deconv_phase_weight(wd)                        # (4*mid, 4*mid)
    b2 = jnp.tile(sh2 + raw["deconv2_b"] * s2, 4)

    s3, sh3 = bn_fold(*raw["bn3"])
    w3 = jnp.transpose(raw["conv3_w"][:, :, 0, 0], (1, 0)) * s3[None, :]
    b3 = sh3 + raw["conv3_b"] * s3
    w3bd = jnp.kron(jnp.eye(4, dtype=w3.dtype), w3)      # per-phase block-diag
    b3t = jnp.tile(b3, 4)

    return {
        "w1": w1.astype(jnp.bfloat16),
        "b1": b1.reshape(1, -1).astype(jnp.float32),
        "w2": w2.astype(jnp.bfloat16),
        "b2": b2.reshape(1, -1).astype(jnp.float32),
        "w3": w3bd.astype(jnp.bfloat16),
        "b3": b3t.reshape(1, -1).astype(jnp.float32),
    }


# ----------------------------------------------------------------------------
# Pure-JAX reference (PyTorch semantics, f32) for correctness check
# ----------------------------------------------------------------------------
def _torch_decoder_ref(raw, x):
    def bn(y, g, b, m, v):
        s = g / jnp.sqrt(v + 1e-5)
        return y * s[None, :, None, None] + (b - m * s)[None, :, None, None]

    def conv1x1(x, w, bias):
        y = jax.lax.conv_general_dilated(
            x, w, (1, 1), "VALID",
            dimension_numbers=("NCHW", "OIHW", "NCHW"))
        return y + bias[None, :, None, None]

    x = jax.nn.relu(bn(conv1x1(x, raw["conv1_w"], raw["conv1_b"]), *raw["bn1"]))
    # ConvTranspose2d(k=3, s=2, p=1, op=1) == lhs-dilated conv with flipped kernel
    wc = jnp.transpose(raw["deconv2_w"][:, :, ::-1, ::-1], (1, 0, 2, 3))
    x = jax.lax.conv_general_dilated(
        x, wc, window_strides=(1, 1), padding=((1, 2), (1, 2)),
        lhs_dilation=(2, 2), dimension_numbers=("NCHW", "OIHW", "NCHW"))
    x = x + raw["deconv2_b"][None, :, None, None]
    x = jax.nn.relu(bn(x, *raw["bn2"]))
    x = jax.nn.relu(bn(conv1x1(x, raw["conv3_w"], raw["conv3_b"]), *raw["bn3"]))
    return x


# ----------------------------------------------------------------------------
if __name__ == "__main__":
    B, in_channels, H, W = 2, 64, 16, 16
    n_filters = 32
    key = jax.random.PRNGKey(0)
    k_in, k_par = jax.random.split(key)
    x = jax.random.normal(k_in, (B, in_channels, H, W), jnp.float32)
    raw, params = build_params(k_par, in_channels, n_filters)

    fwd = jax.jit(decoder_block_forward)
    out = jax.block_until_ready(fwd(params, x))

    assert out.shape == (B, n_filters, 2 * H, 2 * W), out.shape
    assert bool(jnp.all(jnp.isfinite(out)))

    ref = _torch_decoder_ref(raw, x)
    max_err = float(jnp.max(jnp.abs(out - ref)))
    assert bool(jnp.allclose(out, ref, atol=0.1, rtol=0.1)), max_err
    print("KERNEL_OK")
</pallas_src>

<mosaic_0001>
module attributes {stable_mosaic.version = 11 : i64} {
  func.func @_decoder_block_kernel(%arg0: i32, %arg1: memref<128x64xbf16, #tpu.memory_space<vmem>>, %arg2: memref<16x64xbf16, #tpu.memory_space<vmem>>, %arg3: memref<64x16xbf16, #tpu.memory_space<vmem>>, %arg4: memref<1x16xf32, #tpu.memory_space<vmem>>, %arg5: memref<64x64xbf16, #tpu.memory_space<vmem>>, %arg6: memref<1x64xf32, #tpu.memory_space<vmem>>, %arg7: memref<64x128xbf16, #tpu.memory_space<vmem>>, %arg8: memref<1x128xf32, #tpu.memory_space<vmem>>, %arg9: memref<128x128xbf16, #tpu.memory_space<vmem>>) attributes {dimension_semantics = [#tpu.dimension_semantics<parallel>], iteration_bounds = array<i64: 4>, scalar_prefetch = 0 : i64, scratch_operands = 0 : i64, tpu.core_type = #tpu.core_type<tc>, window_params = [{transform_indices = @transform_0, window_bounds = array<i64: 128, 64>}, {transform_indices = @transform_1, window_bounds = array<i64: 16, 64>}, {pipeline_mode = #tpu.pipeline_mode<synchronous>, transform_indices = @transform_2, window_bounds = array<i64: 64, 16>}, {pipeline_mode = #tpu.pipeline_mode<synchronous>, transform_indices = @transform_3, window_bounds = array<i64: 1, 16>}, {pipeline_mode = #tpu.pipeline_mode<synchronous>, transform_indices = @transform_4, window_bounds = array<i64: 64, 64>}, {pipeline_mode = #tpu.pipeline_mode<synchronous>, transform_indices = @transform_5, window_bounds = array<i64: 1, 64>}, {pipeline_mode = #tpu.pipeline_mode<synchronous>, transform_indices = @transform_6, window_bounds = array<i64: 64, 128>}, {pipeline_mode = #tpu.pipeline_mode<synchronous>, transform_indices = @transform_7, window_bounds = array<i64: 1, 128>}, {transform_indices = @transform_8, window_bounds = array<i64: 128, 128>}]} {
    %c0 = arith.constant 0 : index
    %c0_0 = arith.constant 0 : index
    %0 = vector.load %arg1[%c0, %c0_0] : memref<128x64xbf16, #tpu.memory_space<vmem>>, vector<128x64xbf16>
    %c0_1 = arith.constant 0 : index
    %c0_2 = arith.constant 0 : index
    %1 = vector.load %arg3[%c0_1, %c0_2] : memref<64x16xbf16, #tpu.memory_space<vmem>>, vector<64x16xbf16>
    %cst = arith.constant dense<0.000000e+00> : vector<128x16xf32>
    %2 = tpu.matmul %0, %1, %cst {dimension_numbers = #tpu.dot_dimension_numbers<[1], [0], [0], [1], [0, 0, 1, 1], [], []>} : vector<128x64xbf16>, vector<64x16xbf16>, vector<128x16xf32> -> vector<128x16xf32>
    %c0_3 = arith.constant 0 : index
    %c0_4 = arith.constant 0 : index
    %3 = vector.load %arg4[%c0_3, %c0_4] : memref<1x16xf32, #tpu.memory_space<vmem>>, vector<1x16xf32>
    %4 = vector.broadcast %3 : vector<1x16xf32> to vector<128x16xf32>
    %5 = arith.addf %2, %4 : vector<128x16xf32>
    %cst_5 = arith.constant 0.000000e+00 : f32
    %6 = vector.broadcast %cst_5 : f32 to vector<128x16xf32>
    %7 = arith.maximumf %5, %6 : vector<128x16xf32>
    %8 = arith.truncf %7 : vector<128x16xf32> to vector<128x16xbf16>
    %c0_6 = arith.constant 0 : index
    %c0_7 = arith.constant 0 : index
    %9 = vector.load %arg2[%c0_6, %c0_7] : memref<16x64xbf16, #tpu.memory_space<vmem>>, vector<16x64xbf16>
    %c0_8 = arith.constant 0 : index
    %c0_9 = arith.constant 0 : index
    %10 = vector.load %arg3[%c0_8, %c0_9] : memref<64x16xbf16, #tpu.memory_space<vmem>>, vector<64x16xbf16>
    %cst_10 = arith.constant dense<0.000000e+00> : vector<16x16xf32>
    %11 = tpu.matmul %9, %10, %cst_10 {dimension_numbers = #tpu.dot_dimension_numbers<[1], [0], [0], [1], [0, 0, 1, 1], [], []>} : vector<16x64xbf16>, vector<64x16xbf16>, vector<16x16xf32> -> vector<16x16xf32>
    %c0_11 = arith.constant 0 : index
    %c0_12 = arith.constant 0 : index
    %12 = vector.load %arg4[%c0_11, %c0_12] : memref<1x16xf32, #tpu.memory_space<vmem>>, vector<1x16xf32>
    %13 = vector.broadcast %12 : vector<1x16xf32> to vector<16x16xf32>
    %14 = arith.addf %11, %13 : vector<16x16xf32>
    %cst_13 = arith.constant 0.000000e+00 : f32
    %15 = vector.broadcast %cst_13 : f32 to vector<16x16xf32>
    %16 = arith.maximumf %14, %15 : vector<16x16xf32>
    %17 = arith.truncf %16 : vector<16x16xf32> to vector<16x16xbf16>
    %c1_i32 = arith.constant 1 : i32
    %18 = arith.addi %arg0, %c1_i32 : i32
    %c2_i32 = arith.constant 2 : i32
    %c0_i32 = arith.constant 0 : i32
    %19 = arith.cmpi eq, %c2_i32, %c0_i32 : i32
    %c1_i32_14 = arith.constant 1 : i32
    %20 = arith.select %19, %c1_i32_14, %c2_i32 : i32
    %21 = arith.remsi %18, %20 : i32
    %c0_i32_15 = arith.constant 0 : i32
    %22 = arith.cmpi ne, %21, %c0_i32_15 : i32
    %c0_i32_16 = arith.constant 0 : i32
    %23 = arith.cmpi slt, %21, %c0_i32_16 : i32
    %c0_i32_17 = arith.constant 0 : i32
    %24 = arith.cmpi slt, %20, %c0_i32_17 : i32
    %25 = arith.xori %23, %24 : i1
    %26 = arith.andi %25, %22 : i1
    %27 = arith.addi %21, %20 : i32
    %28 = arith.select %26, %27, %21 : i32
    %c0_i32_18 = arith.constant 0 : i32
    %29 = arith.cmpi eq, %28, %c0_i32_18 : i32
    %cst_19 = arith.constant 0.000000e+00 : f32
    %cst_20 = arith.constant 1.000000e+00 : f32
    %30 = arith.select %29, %cst_19, %cst_20 : f32
    %31 = arith.truncf %30 : f32 to bf16
    %32 = vector.broadcast %31 : bf16 to vector<16x16xbf16>
    %33 = arith.mulf %17, %32 : vector<16x16xbf16>
    %cst_21 = arith.constant 0.000000e+00 : bf16
    %34 = vector.broadcast %cst_21 : bf16 to vector<8x16xbf16>
    %35 = tpu.concatenate %8, %33, %34 in 0 : vector<128x16xbf16>, vector<16x16xbf16>, vector<8x16xbf16> -> vector<152x16xbf16>
    %36 = tpu.iota {dimensions = array<i32: 0>} : vector<128x1xi32>
    %c16_i32 = arith.constant 16 : i32
    %c0_i32_22 = arith.constant 0 : i32
    %37 = arith.cmpi eq, %c16_i32, %c0_i32_22 : i32
    %c1_i32_23 = arith.constant 1 : i32
    %38 = arith.select %37, %c1_i32_23, %c16_i32 : i32
    %39 = vector.broadcast %38 : i32 to vector<128x1xi32>
    %40 = arith.remsi %36, %39 : vector<128x1xi32>
    %c0_i32_24 = arith.constant 0 : i32
    %41 = vector.broadcast %c0_i32_24 : i32 to vector<128x1xi32>
    %42 = arith.cmpi ne, %40, %41 : vector<128x1xi32>
    %c0_i32_25 = arith.constant 0 : i32
    %43 = vector.broadcast %c0_i32_25 : i32 to vector<128x1xi32>
    %44 = arith.cmpi slt, %40, %43 : vector<128x1xi32>
    %c0_i32_26 = arith.constant 0 : i32
    %45 = arith.cmpi slt, %38, %c0_i32_26 : i32
    %46 = vector.broadcast %45 : i1 to vector<128x1xi1>
    %47 = vector.broadcast %46 : vector<128x1xi1> to vector<128x1xi1>
    %48 = arith.xori %44, %47 : vector<128x1xi1>
    %49 = arith.andi %48, %42 : vector<128x1xi1>
    %50 = vector.broadcast %38 : i32 to vector<128x1xi32>
    %51 = arith.addi %40, %50 : vector<128x1xi32>
    %52 = arith.select %49, %51, %40 : vector<128x1xi1>, vector<128x1xi32>
    %c15_i32 = arith.constant 15 : i32
    %53 = vector.broadcast %c15_i32 : i32 to vector<128x1xi32>
    %54 = arith.cmpi ne, %52, %53 : vector<128x1xi32>
    %55 = vector.extract_strided_slice %35 {offsets = [1, 0], sizes = [128, 16], strides = [1, 1]} : vector<152x16xbf16> to vector<128x16xbf16>
    %cst_27 = arith.constant 0.000000e+00 : f32
    %56 = arith.truncf %cst_27 : f32 to bf16
    %57 = vector.shape_cast %54 : vector<128x1xi1> to vector<128x1xi1>
    %58 = vector.broadcast %57 : vector<128x1xi1> to vector<128x16xi1>
    %59 = vector.broadcast %56 : bf16 to vector<128x16xbf16>
    %60 = arith.select %58, %55, %59 : vector<128x16xi1>, vector<128x16xbf16>
    %61 = vector.extract_strided_slice %35 {offsets = [16, 0], sizes = [128, 16], strides = [1, 1]} : vector<152x16xbf16> to vector<128x16xbf16>
    %62 = vector.extract_strided_slice %35 {offsets = [17, 0], sizes = [128, 16], strides = [1, 1]} : vector<152x16xbf16> to vector<128x16xbf16>
    %cst_28 = arith.constant 0.000000e+00 : f32
    %63 = arith.truncf %cst_28 : f32 to bf16
    %64 = vector.shape_cast %54 : vector<128x1xi1> to vector<128x1xi1>
    %65 = vector.broadcast %64 : vector<128x1xi1> to vector<128x16xi1>
    %66 = vector.broadcast %63 : bf16 to vector<128x16xbf16>
    %67 = arith.select %65, %62, %66 : vector<128x16xi1>, vector<128x16xbf16>
    %68 = tpu.concatenate %8, %60, %61, %67 in 1 : vector<128x16xbf16>, vector<128x16xbf16>, vector<128x16xbf16>, vector<128x16xbf16> -> vector<128x64xbf16>
    %c0_29 = arith.constant 0 : index
    %c0_30 = arith.constant 0 : index
    %69 = vector.load %arg5[%c0_29, %c0_30] : memref<64x64xbf16, #tpu.memory_space<vmem>>, vector<64x64xbf16>
    %cst_31 = arith.constant dense<0.000000e+00> : vector<128x64xf32>
    %70 = tpu.matmul %68, %69, %cst_31 {dimension_numbers = #tpu.dot_dimension_numbers<[1], [0], [0], [1], [0, 0, 1, 1], [], []>} : vector<128x64xbf16>, vector<64x64xbf16>, vector<128x64xf32> -> vector<128x64xf32>
    %c0_32 = arith.constant 0 : index
    %c0_33 = arith.constant 0 : index
    %71 = vector.load %arg6[%c0_32, %c0_33] : memref<1x64xf32, #tpu.memory_space<vmem>>, vector<1x64xf32>
    %72 = vector.broadcast %71 : vector<1x64xf32> to vector<128x64xf32>
    %73 = arith.addf %70, %72 : vector<128x64xf32>
    %cst_34 = arith.constant 0.000000e+00 : f32
    %74 = vector.broadcast %cst_34 : f32 to vector<128x64xf32>
    %75 = arith.maximumf %73, %74 : vector<128x64xf32>
    %76 = arith.truncf %75 : vector<128x64xf32> to vector<128x64xbf16>
    %c0_35 = arith.constant 0 : index
    %c0_36 = arith.constant 0 : index
    %77 = vector.load %arg7[%c0_35, %c0_36] : memref<64x128xbf16, #tpu.memory_space<vmem>>, vector<64x128xbf16>
    %cst_37 = arith.constant dense<0.000000e+00> : vector<128x128xf32>
    %78 = tpu.matmul %76, %77, %cst_37 {dimension_numbers = #tpu.dot_dimension_numbers<[1], [0], [0], [1], [0, 0, 1, 1], [], []>} : vector<128x64xbf16>, vector<64x128xbf16>, vector<128x128xf32> -> vector<128x128xf32>
    %c0_38 = arith.constant 0 : index
    %c0_39 = arith.constant 0 : index
    %79 = vector.load %arg8[%c0_38, %c0_39] : memref<1x128xf32, #tpu.memory_space<vmem>>, vector<1x128xf32>
    %80 = vector.broadcast %79 : vector<1x128xf32> to vector<128x128xf32>
    %81 = arith.addf %78, %80 : vector<128x128xf32>
    %cst_40 = arith.constant 0.000000e+00 : f32
    %82 = vector.broadcast %cst_40 : f32 to vector<128x128xf32>
    %83 = arith.maximumf %81, %82 : vector<128x128xf32>
    %84 = arith.truncf %83 : vector<128x128xf32> to vector<128x128xbf16>
    %c0_41 = arith.constant 0 : index
    %c0_42 = arith.constant 0 : index
    %85 = vector.load %arg9[%c0_41, %c0_42] : memref<128x128xbf16, #tpu.memory_space<vmem>>, vector<128x128xbf16>
    tpu.vector_store %arg9[%c0_41, %c0_42], %84 {strides = array<i32>} : memref<128x128xbf16, #tpu.memory_space<vmem>>, vector<128x128xbf16>,
    return
  }
  func.func @transform_0(%arg0: i32) -> (i32, i32) {
    %c0_i32 = arith.constant 0 : i32
    %c0_i32_0 = arith.constant 0 : i32
    return %arg0, %c0_i32 : i32, i32
  }
  func.func @transform_1(%arg0: i32) -> (i32, i32) {
    %c1_i32 = arith.constant 1 : i32
    %0 = arith.addi %arg0, %c1_i32 : i32
    %c8_i32 = arith.constant 8 : i32
    %1 = arith.muli %0, %c8_i32 : i32
    %c31_i32 = arith.constant 31 : i32
    %2 = arith.minsi %1, %c31_i32 : i32
    %c0_i32 = arith.constant 0 : i32
    %c0_i32_0 = arith.constant 0 : i32
    return %2, %c0_i32 : i32, i32
  }
  func.func @transform_2(%arg0: i32) -> (i32, i32) {
    %c0_i32 = arith.constant 0 : i32
    %c0_i32_0 = arith.constant 0 : i32
    %c0_i32_1 = arith.constant 0 : i32
    return %c0_i32, %c0_i32_0 : i32, i32
  }
  func.func @transform_3(%arg0: i32) -> (i32, i32) {
    %c0_i32 = arith.constant 0 : i32
    %c0_i32_0 = arith.constant 0 : i32
    %c0_i32_1 = arith.constant 0 : i32
    return %c0_i32, %c0_i32_0 : i32, i32
  }
  func.func @transform_4(%arg0: i32) -> (i32, i32) {
    %c0_i32 = arith.constant 0 : i32
    %c0_i32_0 = arith.constant 0 : i32
    %c0_i32_1 = arith.constant 0 : i32
    return %c0_i32, %c0_i32_0 : i32, i32
  }
  func.func @transform_5(%arg0: i32) -> (i32, i32) {
    %c0_i32 = arith.constant 0 : i32
    %c0_i32_0 = arith.constant 0 : i32
    %c0_i32_1 = arith.constant 0 : i32
    return %c0_i32, %c0_i32_0 : i32, i32
  }
  func.func @transform_6(%arg0: i32) -> (i32, i32) {
    %c0_i32 = arith.constant 0 : i32
    %c0_i32_0 = arith.constant 0 : i32
    %c0_i32_1 = arith.constant 0 : i32
    return %c0_i32, %c0_i32_0 : i32, i32
  }
  func.func @transform_7(%arg0: i32) -> (i32, i32) {
    %c0_i32 = arith.constant 0 : i32
    %c0_i32_0 = arith.constant 0 : i32
    %c0_i32_1 = arith.constant 0 : i32
    return %c0_i32, %c0_i32_0 : i32, i32
  }
  func.func @transform_8(%arg0: i32) -> (i32, i32) {
    %c0_i32 = arith.constant 0 : i32
    %c0_i32_0 = arith.constant 0 : i32
    return %arg0, %c0_i32 : i32, i32
  }
}

</mosaic_0001>

<bundles_post_ra>
// kernel: decoder_block_forward.1
= control target key start
LH: loop header
LB: loop body
LE: loop exit
PB: predicated region body
PF: predicated region fallthrough
CT: control target
= control target key end

     0   :  { %s2017_s27 = smov 0   ;;  %s2612_s0 = inlined_call_operand.vmem [shape: bf16[512,64], index: 0, kind: input, shape index: {}, may-alias: {0,1}]   ;;  %s2613_s1 = inlined_call_operand.vmem [shape: bf16[512,64], index: 1, kind: input, shape index: {}, may-alias: {0,1}]   ;;  %s2614_s2 = inlined_call_operand.vmem [shape: bf16[64,16], index: 2, kind: input, shape index: {}]   ;;  %s2615_s3 = inlined_call_operand.vmem [shape: f32[1,16], index: 3, kind: input, shape index: {}]   ;;  %s2616_s4 = inlined_call_operand.vmem [shape: bf16[64,64], index: 4, kind: input, shape index: {}]   ;;  %s2617_s5 = inlined_call_operand.vmem [shape: f32[1,64], index: 5, kind: input, shape index: {}]   ;;  %s2618_s6 = inlined_call_operand.vmem [shape: bf16[64,128], index: 6, kind: input, shape index: {}]   ;;  %s2619_s7 = inlined_call_operand.vmem [shape: f32[1,128], index: 7, kind: input, shape index: {}]   ;;  %s2620_s8 = inlined_call_operand.vmem [shape: bf16[512,128], index: 8, kind: output, shape index: {}]  }
   0x1 LB: > { %s2023_s28 = sadd.s32 4294967295, %s1965_s27   ;;  %p1735_p0 = scmp.ge.s32.totalorder %s1965_s27, 1  ;;  %s1965_s27 = sphi %s2017_s27, %s18_s27  }
   0x2   : > { %p290_p1 = scmp.lt.s32.totalorder %s1965_s27, 5 }
   0x4   : > { %p291_p2 = pnand %p1735_p0, %p290_p1 }
   0x5   : > { %s1736_s9 = sshll.u32 (!%p291_p2), %s2023_s28, 4  ;;  %s1861_s20 = sshll.u32 (!%p291_p2), %s2023_s28, 3 }
   0x6   : > { %294 = sbr.rel (%p291_p2) target bundleno = 730 (0x2da), region = 52  ;;  %p334_p3 = scmp.lt.s32.totalorder (!%p291_p2), %s1736_s9, 63 }
   0x7   : > { %s1862_s21 = sadd.s32 (!%p291_p2), 8, %s1861_s20  ;;  %s2153_s10 = sadd.s32 (!%p291_p2), 1, %s2023_s28 }
   0x8   : > { %p341_p4 = scmp.lt.s32.totalorder (!%p291_p2), %s1862_s21, 31  ;;  %s590_s11 = ssub.s32 (!%p291_p2), 0, %s2153_s10 }
   0x9   : > { %s2170_s28 = smin.u32 (!%p291_p2), %s590_s11, %s2153_s10  ;;  %p589_p6 = scmp.lt.s32.totalorder (!%p291_p2), %s2153_s10, 0 }
   0xa   : > { %s592_s12 = sand.u32 (!%p291_p2), 1, %s2170_s28   ;;  %s1969_s15 = smov (!%p291_p2), 16  }
   0xb   : > { %v1874_v0 = vld [vmem:[%s2614_s2 + $0x18] sm:$0xff]  ;;  %v1873_v1 = vld [vmem:[%s2614_s2 + $0x10] sm:$0xff]  ;;  %s2664_s9 = smov (!%p334_p3, %s1736_s9), 63  ;;  %v1872_v2 = vld [vmem:[%s2614_s2 + $0x8] sm:$0xff]  ;;  %vm454_vm0 = vcmask 523264   ;;  %s2666_s21 = smov (!%p341_p4, %s1862_s21), 31  ;;  %v678_v12 = vlaneseq }
   0xc   : > { %483 = vmatpush.bf16.msra.mxu0 %v1874_v0  ;;  %1931 = vmatpush.bf16.msra.mxu1 %v1874_v0  ;;  %s1737_s14 = sshll.u32 %s2664_s9, 2  ;;  %v1871_v3 = vld [vmem:[%s2614_s2] sm:$0xff]  ;;  %s1739_s22 = sshll.u32 %s2666_s21, 1  ;;  %vm1967_vm2 = vmmov 1   ;;  %v1968_v17 = vmov 0  }
   0xd   : > { %s2048_s19 = scalar_lea.vmem %s2612_s0, %s1737_s14  ;;  %p344_p5 = scmp.lt.s32.totalorder %s1739_s22, 63  ;;  %v2069_v13 = vshrl.u32 %v678_v12, 7  ;;  %vm935_vm3 = vmpackc.low %vm1967_vm2, %vm1967_vm2  ;;  %v2083_v29 = vld [vmem:[%s2615_s3] ss:$0 sm:$0xff]  ;;  %v2092_v49 = vunpack.c.l.b16 %v1968_v17  ;;  %v2095_v50 = vunpack.c.h.b16 %v1968_v17  ;;  %vm991_vm9 = vsmask.f32 256 }
   0xe   : > { %v1863_v4 = vld [vmem:[%s2048_s19] sm:$0xff]  ;;  %v1864_v5 = vld [vmem:[%s2048_s19 + $0x8] sm:$0xff]  ;;  %v1865_v6 = vld [vmem:[%s2048_s19 + $0x10] sm:$0xff]  ;;  %v951_v18 = vsel %vm935_vm3, 65537, %v1968_v17  ;;  %vm1135_vm3 = vsmask.f32 7424  ;;  %s2599_s28 = scalar_lea.vmem %s2620_s8, %s1737_s14 }
   0xf   : > { %v1866_v7 = vld [vmem:[%s2048_s19 + $0x18] sm:$0xff]  ;;  %s2668_s22 = smov (!%p344_p5, %s1739_s22), 63  ;;  %v1867_v9 = vld [vmem:[%s2048_s19 + $0x20] sm:$0xff]  ;;  %v1868_v11 = vld [vmem:[%s2048_s19 + $0x28] sm:$0xff]  ;;  %v680_v14 = vadd.s32 8, %v2069_v13  ;;  %v2076_v20 = vunpack.c.l.b16 %v951_v18  ;;  %v682_v27 = vadd.s32 24, %v2069_v13 }
  0x10   : > { %484 = vmatpush.bf16.msra.mxu0 %v1873_v1  ;;  %1932 = vmatpush.bf16.msra.mxu1 %v1873_v1  ;;  %v1870_v8 = vld [vmem:[%s2048_s19 + $0x38] sm:$0xff]  ;;  %s1740_s23 = sshll.u32 %s2668_s22, 2  ;;  %v1869_v15 = vld [vmem:[%s2048_s19 + $0x30] sm:$0xff]  ;;  %v684_v32 = vadd.s32 40, %v2069_v13  ;;  %v686_v55 = vadd.s32 56, %v2069_v13  ;;  %s593_s13 = ssub.s32 0, %s592_s12 }
  0x11   : > { %s347_s26 = scalar_lea.vmem %s2613_s1, %s1740_s23  ;;  %v706_v16 = vand.u32 15, %v680_v14  ;;  %v720_v28 = vand.u32 15, %v682_v27  ;;  %s2670_s13 = smov (!%p589_p6, %s593_s13), %s592_s12 }
  0x12   : > { %v1875_v10 = vld [vmem:[%s347_s26] sm:$0xff]  ;;  %v734_v35 = vand.u32 15, %v684_v32  ;;  %v748_v61 = vand.u32 15, %v686_v55  ;;  %p1806_p7 = scmp.lt.s32.totalorder %s2670_s13, 0  ;;  %s599_s16 = sadd.s32 2, %s2670_s13 }
  0x13   : > { %vm888_vm1 = vcmp.ne.s32.totalorder %v706_v16, 15  ;;  %vm890_vm5 = vcmp.ne.s32.totalorder %v720_v28, 15  ;;  %s1970_s17 = smov 32   ;;  %s1971_s20 = smov 48  }
  0x14   : > { %485 = vmatpush.bf16.msra.mxu0 %v1872_v2  ;;  %1933 = vmatpush.bf16.msra.mxu1 %v1872_v2  ;;  %vm936_vm4 = vmpackc.low %vm888_vm1, %vm888_vm1  ;;  %vm892_vm7 = vcmp.ne.s32.totalorder %v734_v35, 15  ;;  %vm894_vm13 = vcmp.ne.s32.totalorder %v748_v61, 15  ;;  %s2672_s16 = smov (!%p1806_p7, %s599_s16), %s2670_s13 }
  0x15   : > { %v952_v19 = vsel %vm936_vm4, 65537, %v1968_v17  ;;  %vm938_vm6 = vmpackc.low %vm890_vm5, %vm890_vm5  ;;  %p601_p8 = scmp.eq.s32.totalorder %s2672_s16, 0 }
  0x16   : > { %v968_v21 = vunpack.c.l.b16 %v952_v19  ;;  %v954_v30 = vsel %vm938_vm6, 65537, %v1968_v17  ;;  %vm940_vm8 = vmpackc.low %vm892_vm7, %vm892_vm7 }
  0x17   : > { %v970_v33 = vunpack.c.l.b16 %v954_v30  ;;  %v956_v48 = vsel %vm940_vm8, 65537, %v1968_v17  ;;  %vm942_vm14 = vmpackc.low %vm894_vm13, %vm894_vm13  ;;  %s2279_s18 = scalar_select %p601_p8, 0.0, 1.0 }
  0x18   : > { %486 = vmatpush.bf16.msra.mxu0 %v1871_v3  ;;  %1934 = vmatpush.bf16.msra.mxu1 %v1871_v3  ;;  %v983_v22 = vpack.c.b16 %v968_v21, %v2076_v20  ;;  %v972_v56 = vunpack.c.l.b16 %v956_v48  ;;  %v958_v19 = vsel %vm942_vm14, 65537, %v1968_v17  ;;  %v688_v21 = vadd.s32 72, %v2069_v13 }
  0x19   : > { %v984_v36 = vpack.c.b16 %v970_v33, %v2076_v20  ;;  %s605_s19 = sshrl.u32 %s2279_s18, 16  ;;  %p604_p9 = scmp.ne.f32.partialorder %s2279_s18, %s2279_s18 }
  0x1a   : > { %v993_v23 = vshrl.u32 %v983_v22, 16  ;;  %v996_v24 = vshll.u32 %v983_v22, 16  ;;  %v985_v62 = vpack.c.b16 %v972_v56, %v2076_v20  ;;  %v762_v30 = vand.u32 15, %v688_v21  ;;  %s606_s21 = sand.u32 1, %s605_s19 }
  0x1b   : > { %1791 = vmatmul.msk.bf16.vlgmr.msra.gmra.mxu0 %vm454_vm0, %v1863_v4  ;;  %1798 = vmatmul.msk.bf16.vlgmr.msra.gmra.mxu1 %vm454_vm0, %v1870_v8  ;;  %v1000_v40 = vshrl.u32 %v984_v36, 16  ;;  %v1003_v45 = vshll.u32 %v984_v36, 16  ;;  %s607_s22 = sadd.s32 32767, %s606_s21 }
  0x1c   : > { %574 = vmatpush.bf16.msrb.mxu1 %v1874_v0  ;;  %v995_v25 = vrot.slane %v993_v23, 7  ;;  %vm2157_vm4 = vcmp.ne.s32.totalorder %v762_v30, 15  ;;  %s608_s23 = sadd.s32 %s607_s22, %s2279_s18 }
  0x1d   : > { %v1002_v44 = vrot.slane %v1000_v40, 7  ;;  %vm944_vm5 = vmpackc.low %vm2157_vm4, %vm2157_vm4  ;;  %s609_s24 = sand.u32 4294901760, %s608_s23 }
  0x1e   : > { %v998_v26 = vor.u32 %v996_v24, %v995_v25  ;;  %s2674_s24 = smov (%p604_p9, %s609_s24), 2143289344 }
  0x1f   : > { %v1005_v57 = vor.u32 %v1003_v45, %v1002_v44  ;;  %s612_s25 = sshrl.u32 %s2674_s24, 16 }
  0x20   : > { %575 = vmatpush.bf16.msrb.mxu1 %v1873_v1  ;;  %v1055_v53 = vunpack.c.l.b16 %v998_v26  ;;  %v1056_v54 = vunpack.c.h.b16 %v998_v26  ;;  %v974_v26 = vunpack.c.l.b16 %v958_v19  ;;  %s613_s26 = sshll.u32 %s612_s25, 16 }
  0x21   : > { %v1006_v63 = vsel %vm991_vm9, %v995_v25, %v1005_v57  ;;  %s614_s29 = sor.u32 %s613_s26, %s612_s25 }
  0x22   : > { %vm2102_vm10 = vcmp.ne.s32.totalorder %v1055_v53, %v2092_v49  ;;  %vm2107_vm11 = vcmp.ne.s32.totalorder %v1056_v54, %v2095_v50  ;;  %v1063_v4 = vunpack.c.h.b16 %v1006_v63  ;;  %v986_v35 = vpack.c.b16 %v974_v26, %v2076_v20 }
  0x23   : > { %vm1061_vm12 = vmpackc.low %vm2107_vm11, %vm2102_vm10  ;;  %v960_v54 = vsel %vm944_vm5, 65537, %v1968_v17 }
  0x24   : > { %576 = vmatpush.bf16.msrb.mxu1 %v1872_v2  ;;  %vm2130_vm1 = vcmp.ne.s32.totalorder %v1063_v4, %v2095_v50  ;;  %v1019_v56 = vshll.u32 %v986_v35, 16  ;;  %v976_v61 = vunpack.c.l.b16 %v960_v54 }
  0x28   : > { %577 = vmatpush.bf16.msrb.mxu1 %v1871_v3  ;;  %v1062_v3 = vunpack.c.l.b16 %v1006_v63 }
  0x2a   : > { %vm2125_vm15 = vcmp.ne.s32.totalorder %v1062_v3, %v2092_v49 }
  0x2b   : > { %1792 = vmatmul.msk.bf16.gmra.mxu0 %vm454_vm0, %v1864_v5  ;;  %1803 = vmatmul.msk.bf16.vlgmr.msrb.gmra.mxu1 %vm454_vm0, %v1875_v10  ;;  %v1008_v5 = vshrl.u32 %v985_v62, 16  ;;  %vm1068_vm2 = vmpackc.low %vm2130_vm1, %vm2125_vm15 }
  0x2d   : > { %v2134_v14 = vrot.slane %v1008_v5, 7 }
  0x3b   : > { %1793 = vmatmul.msk.bf16.gmra.mxu0 %vm454_vm0, %v1865_v6 }
  0x4b   : > { %1794 = vmatmul.msk.bf16.gmra.mxu0 %vm454_vm0, %v1866_v7 }
  0x5b   : > { %1795 = vmatmul.msk.bf16.gmra.mxu0 %vm454_vm0, %v1867_v9 }
  0x6b   : > { %1796 = vmatmul.msk.bf16.gmra.mxu0 %vm454_vm0, %v1868_v11 }
  0x7b   : > { %1797 = vmatmul.msk.bf16.gmra.mxu0 %vm454_vm0, %v1869_v15  ;;  %v1011_v15 = vshll.u32 %v985_v62, 16  ;;  %v690_v62 = vadd.s32 88, %v2069_v13 }
  0x7d   : > { %v1013_v25 = vor.u32 %v1011_v15, %v2134_v14 }
  0x7f   : > { %v1014_v33 = vsel %vm991_vm9, %v1002_v44, %v1013_v25  ;;  %v1016_v44 = vshrl.u32 %v986_v35, 16 }
  0x81   : > { %v2189_v55 = vrot.slane %v1016_v44, 7  ;;  %v692_v44 = vadd.s32 104, %v2069_v13 }
  0x98   : > { %v488_v31 = vpop.f32.mrf.mxu0 }
  0x99   : > { %v489_v34 = vadd.f32 %v2083_v29, %v488_v31 }
  0x9b   : > { %v528_v37 = vmax.f32 %v489_v34, 0.0 }
  0x9d   : > { %v544_v41 = vpack.c.bf16 %v528_v37, %v528_v37 }
  0x9f   : > { %v640_v46 = vunpack.c.l.b16 %v544_v41 }
  0xa0   : > { %v490_v38 = vpop.f32.mrf.mxu0 }
  0xa1   : > { %v491_v39 = vadd.f32 %v2083_v29, %v490_v38 }
  0xa3   : > { %v529_v42 = vmax.f32 %v491_v39, 0.0 }
  0xa5   : > { %v545_v43 = vpack.c.bf16 %v529_v42, %v529_v42  ;;  %v1069_v42 = vunpack.c.l.b16 %v1014_v33 }
  0xa7   : > { %v641_v47 = vunpack.c.l.b16 %v545_v43  ;;  %v1070_v43 = vunpack.c.h.b16 %v1014_v33  ;;  %vm2179_vm6 = vcmp.ne.s32.totalorder %v1069_v42, %v2092_v49 }
  0xa8   : > { %v493_v51 = vpop.f32.mrf.mxu0 }
  0xa9   : > { %v2097_v52 = vpack.c.b16 %v641_v47, %v640_v46  ;;  %v494_v58 = vadd.f32 %v2083_v29, %v493_v51  ;;  %vm2184_vm7 = vcmp.ne.s32.totalorder %v1070_v43, %v2095_v50 }
  0xaa   : > { %vm1075_vm8 = vmpackc.low %vm2184_vm7, %vm2179_vm6 }
  0xab   : > { %v530_v0 = vmax.f32 %v494_v58, 0.0  ;;  %v1118_v6 = vsel %vm1061_vm12, %v2097_v52, 0 }
  0xac   : > { %v1139_v12 = vshll.u32 %v1118_v6, 16  ;;  %v1137_v31 = vshrl.u32 %v1118_v6, 16 }
  0xad   : > { %v546_v7 = vpack.c.bf16 %v530_v0, %v530_v0 }
  0xae   : > { %v1141_v24 = vrot.slane %v1139_v12, 1 }
  0xaf   : > { %v642_v16 = vunpack.c.l.b16 %v546_v7 }
  0xb0   : > { %v495_v1 = vpop.f32.mrf.mxu0  ;;  %v1142_v36 = vor.u32 %v1141_v24, %v1137_v31 }
  0xb1   : > { %v496_v2 = vadd.f32 %v2083_v29, %v495_v1  ;;  %v1021_v1 = vor.u32 %v1019_v56, %v2189_v55 }
  0xb3   : > { %v531_v8 = vmax.f32 %v496_v2, 0.0 }
  0xb5   : > { %v547_v9 = vpack.c.bf16 %v531_v8, %v531_v8  ;;  %v987_v8 = vpack.c.b16 %v976_v61, %v2076_v20 }
  0xb7   : > { %v643_v18 = vunpack.c.l.b16 %v547_v9  ;;  %v776_v9 = vand.u32 15, %v690_v62  ;;  %v1024_v24 = vshrl.u32 %v987_v8, 16 }
  0xb8   : > { %v498_v22 = vpop.f32.mrf.mxu0 }
  0xb9   : > { %v2142_v23 = vpack.c.b16 %v643_v18, %v642_v16  ;;  %v499_v27 = vadd.f32 %v2083_v29, %v498_v22  ;;  %v1022_v22 = vsel %vm991_vm9, %v2134_v14, %v1021_v1  ;;  %vm2224_vm10 = vcmp.ne.s32.totalorder %v776_v9, 15  ;;  %v2233_v14 = vpop.f32.mrf.mxu1 }
  0xba   : > { %v1076_v31 = vunpack.c.l.b16 %v1022_v22  ;;  %vm946_vm11 = vmpackc.low %vm2224_vm10, %vm2224_vm10  ;;  %v2238_v33 = vrot.slane %v1024_v24, 7 }
  0xbb   : > { %v1119_v28 = vsel %vm1068_vm2, %v2142_v23, 0  ;;  %v532_v37 = vmax.f32 %v499_v27, 0.0  ;;  %v1127_v47 = vsel %vm1061_vm12, %v2142_v23, 0 }
  0xbc   : > { %v1144_v32 = vshll.u32 %v1119_v28, 16  ;;  %v1239_v59 = vshll.u32 %v1127_v47, 16  ;;  %v1148_v0 = vshrl.u32 %v1119_v28, 16  ;;  %v1237_v12 = vshrl.u32 %v1127_v47, 16 }
  0xbd   : > { %v548_v45 = vpack.c.bf16 %v532_v37, %v532_v37  ;;  %vm2243_vm12 = vcmp.ne.s32.totalorder %v1076_v31, %v2092_v49 }
  0xbe   : > { %v1146_v34 = vrot.slane %v1144_v32, 1  ;;  %v1241_v5 = vrot.slane %v1239_v59, 1  ;;  %v1077_v32 = vunpack.c.h.b16 %v1022_v22  ;;  %v790_v59 = vand.u32 15, %v692_v44 }
  0xbf   : > { %v644_v57 = vunpack.c.l.b16 %v548_v45 }
  0xc0   : > { %v500_v39 = vpop.f32.mrf.mxu0  ;;  %v2163_v40 = vsel %vm1135_vm3, %v1142_v36, %v1146_v34  ;;  %v1150_v15 = vor.u32 %v1148_v0, %v1146_v34  ;;  %v1242_v21 = vor.u32 %v1241_v5, %v1237_v12  ;;  %v1027_v34 = vshll.u32 %v987_v8, 16 }
  0xc1   : > { %v501_v41 = vadd.f32 %v2083_v29, %v500_v39  ;;  %v962_v36 = vsel %vm946_vm11, 65537, %v1968_v17  ;;  %vm2248_vm13 = vcmp.ne.s32.totalorder %v1077_v32, %v2095_v50  ;;  %vm2291_vm15 = vcmp.ne.s32.totalorder %v790_v59, 15 }
  0xc2   : > { %v1029_v43 = vor.u32 %v1027_v34, %v2238_v33  ;;  %v978_v47 = vunpack.c.l.b16 %v962_v36  ;;  %vm1082_vm14 = vmpackc.low %vm2248_vm13, %vm2243_vm12 }
  0xc3   : > { %v533_v46 = vmax.f32 %v501_v41, 0.0 }
  0xc4   : > { %v988_v53 = vpack.c.b16 %v978_v47, %v2076_v20 }
  0xc5   : > { %v549_v48 = vpack.c.bf16 %v533_v46, %v533_v46 }
  0xc6   : > { %v1032_v9 = vshrl.u32 %v988_v53, 16  ;;  %v1035_v24 = vshll.u32 %v988_v53, 16 }
  0xc7   : > { %v645_v58 = vunpack.c.l.b16 %v549_v48 }
  0xc8   : > { %v503_v60 = vpop.f32.mrf.mxu0  ;;  %v2311_v22 = vrot.slane %v1032_v9, 7 }
  0xc9   : > { %v2198_v63 = vpack.c.b16 %v645_v58, %v644_v57  ;;  %v504_v2 = vadd.f32 %v2083_v29, %v503_v60  ;;  %v1030_v57 = vsel %vm991_vm9, %v2189_v55, %v1029_v43  ;;  %v2276_v58 = vpop.f32.mrf.mxu1  ;;  %v694_v55 = vadd.s32 120, %v2069_v13 }
  0xca   : > { %v1083_v0 = vunpack.c.l.b16 %v1030_v57  ;;  %v1084_v5 = vunpack.c.h.b16 %v1030_v57 }
  0xcb   : > { %v2208_v3 = vsel %vm1075_vm8, %v2198_v63, 0  ;;  %v1128_v4 = vsel %vm1068_vm2, %v2198_v63, 0  ;;  %v534_v19 = vmax.f32 %v504_v2, 0.0  ;;  %v804_v12 = vand.u32 15, %v694_v55  ;;  %vm948_vm2 = vmpackc.low %vm2291_vm15, %vm2291_vm15 }
  0xcc   : > { %v1152_v6 = vshll.u32 %v2208_v3, 16  ;;  %v1244_v7 = vshll.u32 %v1128_v4, 16  ;;  %v1248_v54 = vshrl.u32 %v1128_v4, 16  ;;  %vm2298_vm1 = vcmp.ne.s32.totalorder %v1083_v0, %v2092_v49 }
  0xcd   : > { %v550_v28 = vpack.c.bf16 %v534_v19, %v534_v19  ;;  %vm2307_vm4 = vcmp.ne.s32.totalorder %v1084_v5, %v2095_v50  ;;  %vm902_vm5 = vcmp.ne.s32.totalorder %v804_v12, 15 }
  0xce   : > { %v2218_v16 = vrot.slane %v1152_v6, 1  ;;  %v1246_v18 = vrot.slane %v1244_v7, 1  ;;  %vm950_vm6 = vmpackc.low %vm902_vm5, %vm902_vm5 }
  0xcf   : > { %v646_v37 = vunpack.c.l.b16 %v550_v28  ;;  %vm1089_vm7 = vmpackc.low %vm2307_vm4, %vm2298_vm1  ;;  %v966_v32 = vsel %vm950_vm6, 65537, %v1968_v17  ;;  %vm1345_vm6 = vcmask 261120  }
  0xd0   : > { %v505_v11 = vpop.f32.mrf.mxu0  ;;  %v1155_v10 = vsel %vm1135_vm3, %v1150_v15, %v2218_v16  ;;  %v2231_v27 = vsel %vm1135_vm3, %v1242_v21, %v1246_v18  ;;  %v1250_v61 = vor.u32 %v1248_v54, %v1246_v18  ;;  %v1156_v18 = vshrl.u32 %v2208_v3, 16 }
  0xd1   : > { %v506_v26 = vadd.f32 %v2083_v29, %v505_v11  ;;  %1206 = vrot.lane.b32.xlu0 %v1155_v10, %s1969_s15  ;;  %v964_v3 = vsel %vm948_vm2, 65537, %v1968_v17 }
  0xd2   : > { %v1158_v25 = vor.u32 %v1156_v18, %v2218_v16  ;;  %v980_v36 = vunpack.c.l.b16 %v964_v3 }
  0xd3   : > { %v535_v30 = vmax.f32 %v506_v26, 0.0  ;;  %v579_v26 = vpop.f32.mrf.mxu1 }
  0xd4   : > { %v989_v54 = vpack.c.b16 %v980_v36, %v2076_v20 }
  0xd5   : > { %v551_v35 = vpack.c.bf16 %v535_v30, %v535_v30 }
  0xd6   : > { %v1043_v18 = vshll.u32 %v989_v54, 16 }
  0xd7   : > { %v647_v38 = vunpack.c.l.b16 %v551_v35  ;;  %v1037_v35 = vor.u32 %v1035_v24, %v2311_v22 }
  0xd8   : > { %v508_v42 = vpop.f32.mrf.mxu0 }
  0xd9   : > { %v2254_v45 = vpack.c.b16 %v647_v38, %v646_v37  ;;  %v509_v46 = vadd.f32 %v2083_v29, %v508_v42  ;;  %1222 = vrot.lane.b32.xlu0 %v2198_v63, %s1970_s17  ;;  %v982_v42 = vunpack.c.l.b16 %v966_v32  ;;  %v1038_v47 = vsel %vm991_vm9, %v2238_v33, %v1037_v35 }
  0xda   : > { %v1090_v55 = vunpack.c.l.b16 %v1038_v47  ;;  %v1091_v0 = vunpack.c.h.b16 %v1038_v47 }
  0xdb   : > { %1224 = vrot.lane.b32.xlu2 %v2254_v45, %s1970_s17  ;;  %v2271_v48 = vsel %vm1075_vm8, %v2254_v45, 0  ;;  %v536_v60 = vmax.f32 %v509_v46, 0.0  ;;  %v1121_v51 = vsel %vm1082_vm14, %v2254_v45, 0  ;;  %v581_v33 = vpop.f32.mrf.mxu1 }
  0xdc   : > { %v1252_v56 = vshll.u32 %v2271_v48, 16  ;;  %v1160_v4 = vshll.u32 %v1121_v51, 16  ;;  %v1256_v41 = vshrl.u32 %v2271_v48, 16  ;;  %v1164_v43 = vshrl.u32 %v1121_v51, 16 }
  0xdd   : > { %v552_v7 = vpack.c.bf16 %v536_v60, %v536_v60  ;;  %v990_v48 = vpack.c.b16 %v982_v42, %v2076_v20  ;;  %v580_v20 = vadd.f32 %v2083_v29, %v579_v26  ;;  %v582_v5 = vadd.f32 %v2083_v29, %v581_v33 }
  0xde   : > { %v1254_v62 = vrot.slane %v1252_v56, 1  ;;  %v1162_v19 = vrot.slane %v1160_v4, 1  ;;  %vm2368_vm8 = vcmp.ne.s32.totalorder %v1090_v55, %v2092_v49  ;;  %vm2373_vm10 = vcmp.ne.s32.totalorder %v1091_v0, %v2095_v50 }
  0xdf   : > { %v648_v11 = vunpack.c.l.b16 %v552_v7  ;;  %v1048_v6 = vshrl.u32 %v990_v48, 16  ;;  %v585_v24 = vmax.f32 %v582_v5, 0.0  ;;  %v1051_v26 = vshll.u32 %v990_v48, 16  ;;  %vm1096_vm11 = vmpackc.low %vm2373_vm10, %vm2368_vm8 }
  0xe0   : > { %v510_v1 = vpop.f32.mrf.mxu0  ;;  %v1255_v2 = vsel %vm1135_vm3, %v1250_v61, %v1254_v62  ;;  %v1163_v31 = vsel %vm1135_vm3, %v1158_v25, %v1162_v19  ;;  %v1258_v56 = vor.u32 %v1256_v41, %v1254_v62  ;;  %v1166_v59 = vor.u32 %v1164_v43, %v1162_v19 }
  0xe1   : > { %v511_v8 = vadd.f32 %v2083_v29, %v510_v1  ;;  %1306 = vrot.lane.b32.xlu1 %v1255_v2, %s1971_s20  ;;  %v1040_v2 = vshrl.u32 %v989_v54, 16  ;;  %v524_v19 = vadd.f32 %v2083_v29, %v2233_v14  ;;  %v2379_v25 = vrot.slane %v1048_v6, 7 }
  0xe3   : > { %v537_v13 = vmax.f32 %v511_v8, 0.0  ;;  %v542_v32 = vmax.f32 %v524_v19, 0.0  ;;  %v1053_v42 = vor.u32 %v1051_v26, %v2379_v25  ;;  %v1879_v19 = vld [vmem:[%s2616_s4 + $0x18] sm:$0xff] }
  0xe4   : > { %1935 = vmatpush.bf16.msra.mxu2 %v1879_v19  ;;  %1435 = vmatpush.bf16.msra.mxu1 %v1879_v19 }
  0xe5   : > { %v553_v10 = vpack.c.bf16 %v537_v13, %v537_v13  ;;  %v1042_v13 = vrot.slane %v1040_v2, 7 }
  0xe7   : > { %v649_v28 = vunpack.c.l.b16 %v553_v10 }
  0xe8   : > { %v513_v30 = vpop.f32.mrf.mxu0 }
  0xe9   : > { %v2321_v34 = vpack.c.b16 %v649_v28, %v648_v11  ;;  %v514_v16 = vadd.f32 %v2083_v29, %v513_v30  ;;  %1208 = vrot.lane.b32.xlu1 %v1163_v31, %s1969_s15  ;;  %v584_v11 = vmax.f32 %v580_v20, 0.0  ;;  %v526_v28 = vadd.f32 %v2083_v29, %v2276_v58 }
  0xea   : > { %v1045_v31 = vor.u32 %v1043_v18, %v1042_v13 }
  0xeb   : > { %v2333_v37 = vsel %vm1082_vm14, %v2321_v34, 0  ;;  %v2341_v38 = vsel %vm1089_vm7, %v2321_v34, 0  ;;  %v538_v46 = vmax.f32 %v514_v16, 0.0  ;;  %v586_v36 = vpack.c.bf16 %v584_v11, %v584_v11  ;;  %v1878_v11 = vld [vmem:[%s2616_s4 + $0x10] sm:$0xff] }
  0xec   : > { %v1260_v39 = vshll.u32 %v2333_v37, 16  ;;  %v1168_v44 = vshll.u32 %v2341_v38, 16  ;;  %v1264_v16 = vshrl.u32 %v2333_v37, 16  ;;  %v1172_v35 = vshrl.u32 %v2341_v38, 16  ;;  %1936 = vmatpush.bf16.msra.mxu2 %v1878_v11  ;;  %1436 = vmatpush.bf16.msra.mxu1 %v1878_v11 }
  0xed   : > { %v554_v1 = vpack.c.bf16 %v538_v46, %v538_v46  ;;  %v587_v38 = vpack.c.bf16 %v585_v24, %v585_v24  ;;  %v543_v21 = vmax.f32 %v526_v28, 0.0 }
  0xee   : > { %v1262_v57 = vrot.slane %v1260_v39, 1  ;;  %v1170_v60 = vrot.slane %v1168_v44, 1  ;;  %v615_v39 = vstv %s614_s29  ;;  %v1046_v44 = vsel %vm991_vm9, %v2311_v22, %v1045_v31 }
  0xef   : > { %v650_v9 = vunpack.c.l.b16 %v554_v1  ;;  %v619_v48 = vunpack.c.l.bf16 %v615_v39  ;;  %v559_v55 = vpack.c.bf16 %v543_v21, %v543_v21  ;;  %v1097_v22 = vunpack.c.l.b16 %v1046_v44 }
  0xf0   : > { %v515_v51 = vpop.f32.mrf.mxu0  ;;  %v1263_v53 = vsel %vm1135_vm3, %v1258_v56, %v1262_v57  ;;  %v1171_v61 = vsel %vm1135_vm3, %v1166_v59, %v1170_v60  ;;  %v1266_v46 = vor.u32 %v1264_v16, %v1262_v57  ;;  %v1174_v54 = vor.u32 %v1172_v35, %v1170_v60 }
  0xf1   : > { %v516_v62 = vadd.f32 %v2083_v29, %v515_v51  ;;  %1308 = vrot.lane.b32.xlu2 %v1263_v53, %s1971_s20  ;;  %1226 = vrot.lane.b32.xlu1 %v2321_v34, %s1970_s17  ;;  %v617_v59 = vunpack.c.l.bf16 %v586_v36  ;;  %v618_v51 = vunpack.c.l.bf16 %v587_v38  ;;  %v1054_v53 = vsel %vm991_vm9, %v1042_v13, %v1053_v42 }
  0xf2   : > { %1210 = vrot.lane.b32.xlu0 %v1171_v61, %s1969_s15  ;;  %v558_v61 = vpack.c.bf16 %v542_v32, %v542_v32  ;;  %v1098_v57 = vunpack.c.h.b16 %v1046_v44  ;;  %v1104_v60 = vunpack.c.l.b16 %v1054_v53  ;;  %v1105_v20 = vunpack.c.h.b16 %v1054_v53 }
  0xf3   : > { %v539_v4 = vmax.f32 %v516_v62, 0.0  ;;  %v620_v5 = vmul.f32 %v619_v48, %v617_v59  ;;  %v621_v6 = vmul.f32 %v619_v48, %v618_v51  ;;  %vm2422_vm9 = vcmp.ne.s32.totalorder %v1097_v22, %v2092_v49 }
  0xf4   : > { %vm2427_vm12 = vcmp.ne.s32.totalorder %v1098_v57, %v2095_v50  ;;  %vm2432_vm13 = vcmp.ne.s32.totalorder %v1104_v60, %v2092_v49  ;;  %vm2437_vm14 = vcmp.ne.s32.totalorder %v1105_v20, %v2095_v50  ;;  %v1111_v31 = vunpack.c.l.b16 %v2379_v25 }
  0xf5   : > { %v555_v12 = vpack.c.bf16 %v539_v4, %v539_v4  ;;  %v622_v26 = vpack.c.bf16 %v620_v5, %v620_v5  ;;  %vm1103_vm15 = vmpackc.low %vm2427_vm12, %vm2422_vm9  ;;  %v1112_v32 = vunpack.c.h.b16 %v2379_v25 }
  0xf6   : > { %vm1110_vm1 = vmpackc.low %vm2437_vm14, %vm2432_vm13  ;;  %vm2474_vm2 = vcmp.ne.s32.totalorder %v1111_v31, %v2092_v49 }
  0xf7   : > { %v651_v10 = vunpack.c.l.b16 %v555_v12  ;;  %v655_v12 = vunpack.c.l.b16 %v559_v55  ;;  %v674_v36 = vunpack.c.l.b16 %v622_v26  ;;  %vm2479_vm4 = vcmp.ne.s32.totalorder %v1112_v32, %v2095_v50 }
  0xf8   : > { %v518_v3 = vpop.f32.mrf.mxu0  ;;  %vm1117_vm5 = vmpackc.low %vm2479_vm4, %vm2474_vm2 }
  0xf9   : > { %v2387_v30 = vpack.c.b16 %v651_v10, %v650_v9  ;;  %v519_v14 = vadd.f32 %v2083_v29, %v518_v3  ;;  %v654_v9 = vunpack.c.l.b16 %v558_v61  ;;  %v623_v3 = vpack.c.bf16 %v621_v6, %v621_v6  ;;  %v1876_v10 = vld [vmem:[%s2616_s4] sm:$0xff] }
  0xfb   : > { %v2398_v58 = vsel %vm1089_vm7, %v2387_v30, 0  ;;  %1228 = vrot.lane.b32.xlu1 %v2387_v30, %s1970_s17  ;;  %v2408_v37 = vsel %vm1096_vm11, %v2387_v30, 0  ;;  %v540_v43 = vmax.f32 %v519_v14, 0.0  ;;  %v2441_v28 = vpack.c.b16 %v655_v12, %v654_v9 }
  0xfc   : > { %v1268_v15 = vshll.u32 %v2398_v58, 16  ;;  %v1176_v41 = vshll.u32 %v2408_v37, 16  ;;  %v1272_v16 = vshrl.u32 %v2398_v58, 16  ;;  %v1180_v35 = vshrl.u32 %v2408_v37, 16 }
  0xfd   : > { %v556_v62 = vpack.c.bf16 %v540_v43, %v540_v43  ;;  %v675_v38 = vunpack.c.l.b16 %v623_v3  ;;  %v1133_v58 = vsel %vm1103_vm15, %v2441_v28, 0  ;;  %v1125_v37 = vsel %vm1110_vm1, %v2441_v28, 0 }
  0xfe   : > { %v1270_v47 = vrot.slane %v1268_v15, 1  ;;  %v1178_v56 = vrot.slane %v1176_v41, 1  ;;  %vm1362_vm7 = vcmask 392192  }
  0xff   : > { %v652_v13 = vunpack.c.l.b16 %v556_v62  ;;  %v676_v59 = vpack.c.b16 %v675_v38, %v674_v36  ;;  %v1196_v62 = vshrl.u32 %v1125_v37, 16 }
 0x100   : > { %v520_v0 = vpop.f32.mrf.mxu0  ;;  %v1271_v33 = vsel %vm1135_vm3, %v1266_v46, %v1270_v47  ;;  %v1179_v1 = vsel %vm1135_vm3, %v1174_v54, %v1178_v56  ;;  %v1274_v41 = vor.u32 %v1272_v16, %v1270_v47  ;;  %v1182_v43 = vor.u32 %v1180_v35, %v1178_v56 }
 0x101   : > { %v521_v2 = vadd.f32 %v2083_v29, %v520_v0  ;;  %1310 = vrot.lane.b32.xlu2 %v1271_v33, %s1971_s20  ;;  %1212 = vrot.lane.b32.xlu0 %v1179_v1, %s1969_s15  ;;  %v1284_v46 = vshll.u32 %v1133_v58, 16  ;;  %v1192_v54 = vshll.u32 %v1125_v37, 16  ;;  %v1134_v50 = vsel %vm1110_vm1, %v676_v59, 0 }
 0x102   : > { %v1126_v47 = vsel %vm1117_vm5, %v676_v59, 0  ;;  %v1288_v33 = vshrl.u32 %v1133_v58, 16  ;;  %v1292_v1 = vshll.u32 %v1134_v50, 16  ;;  %v1296_v12 = vshrl.u32 %v1134_v50, 16 }
 0x103   : > { %v541_v4 = vmax.f32 %v521_v2, 0.0  ;;  %v1286_v61 = vrot.slane %v1284_v46, 1  ;;  %v1194_v0 = vrot.slane %v1192_v54, 1  ;;  %v1200_v2 = vshll.u32 %v1126_v47, 16 }
 0x104   : > { %v1294_v20 = vrot.slane %v1292_v1, 1 }
 0x105   : > { %v557_v18 = vpack.c.bf16 %v541_v4, %v541_v4  ;;  %v1290_v60 = vor.u32 %v1288_v33, %v1286_v61  ;;  %v1198_v4 = vor.u32 %v1196_v62, %v1194_v0  ;;  %v1202_v5 = vrot.slane %v1200_v2, 1 }
 0x107   : > { %v653_v24 = vunpack.c.l.b16 %v557_v18  ;;  %v1295_v6 = vsel %vm1135_vm3, %v1290_v60, %v1294_v20  ;;  %v1203_v9 = vsel %vm1135_vm3, %v1198_v4, %v1202_v5  ;;  %v1302_v18 = vrot.slane %v1968_v17, 1  ;;  %v1877_v17 = vld [vmem:[%s2616_s4 + $0x8] sm:$0xff]  ;;  %v1882_v60 = vld [vmem:[%s2618_s6 + $0x10] sm:$0xff]  ;;  %v1957_v5 = vld [vmem:[%s2617_s5] ss:$0 sm:$0xff] }
 0x108   : > { %1937 = vmatpush.bf16.msra.mxu2 %v1877_v17  ;;  %1437 = vmatpush.bf16.msra.mxu1 %v1877_v17 }
 0x109   : > { %v2447_v14 = vpack.c.b16 %v653_v24, %v652_v13  ;;  %v1298_v13 = vor.u32 %v1296_v12, %v1294_v20  ;;  %v1880_v20 = vld [vmem:[%s2618_s6] sm:$0xff] }
 0x10b   : > { %1230 = vrot.lane.b32.xlu1 %v2447_v14, %s1970_s17  ;;  %v1132_v42 = vsel %vm1096_vm11, %v2447_v14, 0  ;;  %v1124_v21 = vsel %vm1103_vm15, %v2447_v14, 0  ;;  %v1303_v29 = vsel %vm1135_vm3, %v1298_v13, %v1302_v18 }
 0x10c   : > { %v1276_v15 = vshll.u32 %v1132_v42, 16  ;;  %v1184_v25 = vshll.u32 %v1124_v21, 16  ;;  %v1280_v49 = vshrl.u32 %v1132_v42, 16  ;;  %v1188_v53 = vshrl.u32 %v1124_v21, 16  ;;  %1938 = vmatpush.bf16.msra.mxu2 %v1876_v10  ;;  %1438 = vmatpush.bf16.msra.mxu1 %v1876_v10 }
 0x10e   : > { %v1278_v39 = vrot.slane %v1276_v15, 1  ;;  %v1186_v44 = vrot.slane %v1184_v25, 1 }
 0x110   : > { %v1279_v48 = vsel %vm1135_vm3, %v1274_v41, %v1278_v39  ;;  %v1187_v51 = vsel %vm1135_vm3, %v1182_v43, %v1186_v44  ;;  %v1282_v56 = vor.u32 %v1280_v49, %v1278_v39  ;;  %v1190_v55 = vor.u32 %v1188_v53, %v1186_v44 }
 0x111   : > { %1312 = vrot.lane.b32.xlu2 %v1279_v48, %s1971_s20  ;;  %1214 = vrot.lane.b32.xlu0 %v1187_v51, %s1969_s15 }
 0x112   : > { %v1287_v22 = vsel %vm1135_vm3, %v1282_v56, %v1286_v61  ;;  %v1195_v57 = vsel %vm1135_vm3, %v1190_v55, %v1194_v0  ;;  %vm1320_vm3 = vcmask 130048  }
 0x113   : > { %1232 = vrot.lane.b32.xlu1 %v2441_v28, %s1970_s17 }
 0x119   : > { %1314 = vrot.lane.b32.xlu2 %v1287_v22, %s1971_s20  ;;  %1216 = vrot.lane.b32.xlu0 %v1195_v57, %s1969_s15 }
 0x11b   : > { %1234 = vrot.lane.b32.xlu1 %v676_v59, %s1970_s17 }
 0x121   : > { %1316 = vrot.lane.b32.xlu2 %v1295_v6, %s1971_s20  ;;  %1218 = vrot.lane.b32.xlu0 %v1203_v9, %s1969_s15 }
 0x123   : > { %1220 = vrot.lane.b32.xlu1 %v2142_v23, %s1970_s17 }
 0x129   : > { %1318 = vrot.lane.b32.xlu2 %v1303_v29, %s1971_s20  ;;  %1204 = vrot.lane.b32.xlu0 %v2163_v40, %s1969_s15 }
 0x131   : > { %1304 = vrot.lane.b32.xlu2 %v2231_v27, %s1971_s20 }
 0x135   : > { %v1225_v16 = vpop.permute.xlu2 %1224 }
 0x143   : > { %v1207_v24 = vpop.permute.xlu0 %1206 }
 0x144   : > { %v1326_v26 = vsel %vm1320_vm3, %v2142_v23, %v1207_v24 }
 0x14b   : > { %v1223_v40 = vpop.permute.xlu0 %1222  ;;  %v1309_v38 = vpop.permute.xlu2 %1308 }
 0x14c   : > { %v1349_v3 = vsel %vm1345_vm6, %v1326_v26, %v1223_v40 }
 0x153   : > { %v1307_v31 = vpop.permute.xlu1 %1306 }
 0x154   : > { %v1366_v32 = vsel %vm1362_vm7, %v1349_v3, %v1307_v31 }
 0x155   : > { %1824 = vmatmul.msk.bf16.vlgmr.msra.gmra.mxu2 %vm454_vm0, %v1366_v32 }
 0x15b   : > { %v1209_v35 = vpop.permute.xlu1 %1208  ;;  %v1311_v21 = vpop.permute.xlu2 %1310 }
 0x15c   : > { %v1329_v27 = vsel %vm1320_vm3, %v2198_v63, %v1209_v35 }
 0x15d   : > { %v1351_v36 = vsel %vm1345_vm6, %v1329_v27, %v1225_v16 }
 0x15e   : > { %v1368_v42 = vsel %vm1362_vm7, %v1351_v36, %v1309_v38 }
 0x163   : > { %v1227_v15 = vpop.permute.xlu1 %1226 }
 0x164   : > { %v1211_v23 = vpop.permute.xlu0 %1210 }
 0x165   : > { %1825 = vmatmul.msk.bf16.gmra.mxu2 %vm454_vm0, %v1368_v42  ;;  %v1332_v25 = vsel %vm1320_vm3, %v2254_v45, %v1211_v23 }
 0x166   : > { %v1353_v58 = vsel %vm1345_vm6, %v1332_v25, %v1227_v15 }
 0x167   : > { %v1370_v37 = vsel %vm1362_vm7, %v1353_v58, %v1311_v21 }
 0x16b   : > { %v1313_v8 = vpop.permute.xlu2 %1312 }
 0x16d   : > { %v1229_v63 = vpop.permute.xlu1 %1228 }
 0x173   : > { %v1213_v7 = vpop.permute.xlu0 %1212  ;;  %v1315_v43 = vpop.permute.xlu2 %1314 }
 0x174   : > { %v1335_v41 = vsel %vm1320_vm3, %v2321_v34, %v1213_v7 }
 0x175   : > { %1826 = vmatmul.msk.bf16.gmra.mxu2 %vm454_vm0, %v1370_v37  ;;  %v1355_v44 = vsel %vm1345_vm6, %v1335_v41, %v1229_v63 }
 0x176   : > { %v1372_v54 = vsel %vm1362_vm7, %v1355_v44, %v1313_v8 }
 0x17b   : > { %v1317_v59 = vpop.permute.xlu2 %1316 }
 0x17d   : > { %v1231_v39 = vpop.permute.xlu1 %1230 }
 0x183   : > { %v1215_v46 = vpop.permute.xlu0 %1214  ;;  %v1319_v50 = vpop.permute.xlu2 %1318 }
 0x184   : > { %v1338_v51 = vsel %vm1320_vm3, %v2387_v30, %v1215_v46 }
 0x185   : > { %1827 = vmatmul.msk.bf16.gmra.mxu2 %vm454_vm0, %v1372_v54  ;;  %v1233_v45 = vpop.permute.xlu1 %1232  ;;  %v1357_v49 = vsel %vm1345_vm6, %v1338_v51, %v1231_v39 }
 0x186   : > { %v1374_v47 = vsel %vm1362_vm7, %v1357_v49, %v1315_v43 }
 0x18b   : > { %v1217_v48 = vpop.permute.xlu0 %1216  ;;  %v1305_v0 = vpop.permute.xlu2 %1304 }
 0x18c   : > { %v1341_v30 = vsel %vm1320_vm3, %v2447_v14, %v1217_v48  ;;  %v1883_v14 = vld [vmem:[%s2618_s6 + $0x18] sm:$0xff] }
 0x18d   : > { %v1235_v53 = vpop.permute.xlu1 %1234  ;;  %v1359_v62 = vsel %vm1345_vm6, %v1341_v30, %v1233_v45  ;;  %1939 = vmatpush.bf16.msra.mxu3 %v1883_v14  ;;  %1568 = vmatpush.bf16.msrb.mxu1 %v1883_v14 }
 0x18e   : > { %v1376_v2 = vsel %vm1362_vm7, %v1359_v62, %v1317_v59 }
 0x191   : > { %1940 = vmatpush.bf16.msra.mxu3 %v1882_v60  ;;  %1569 = vmatpush.bf16.msrb.mxu1 %v1882_v60 }
 0x193   : > { %v1219_v34 = vpop.permute.xlu0 %1218 }
 0x194   : > { %v1344_v22 = vsel %vm1320_vm3, %v2441_v28, %v1219_v34  ;;  %v1881_v28 = vld [vmem:[%s2618_s6 + $0x8] sm:$0xff] }
 0x195   : > { %1828 = vmatmul.msk.bf16.gmra.mxu2 %vm454_vm0, %v1374_v47  ;;  %v1221_v61 = vpop.permute.xlu1 %1220  ;;  %1941 = vmatpush.bf16.msra.mxu3 %v1881_v28 }
 0x196   : > { %1570 = vmatpush.bf16.msrb.mxu1 %v1881_v28 }
 0x199   : > { %1942 = vmatpush.bf16.msra.mxu3 %v1880_v20 }
 0x19a   : > { %1571 = vmatpush.bf16.msrb.mxu1 %v1880_v20 }
 0x19b   : > { %v1205_v56 = vpop.permute.xlu0 %1204 }
 0x19c   : > { %v1323_v55 = vsel %vm1320_vm3, %v2097_v52, %v1205_v56  ;;  %v1361_v52 = vsel %vm1345_vm6, %v1344_v22, %v1235_v53 }
 0x19d   : > { %v1347_v33 = vsel %vm1345_vm6, %v1323_v55, %v1221_v61  ;;  %v1378_v57 = vsel %vm1362_vm7, %v1361_v52, %v1319_v50  ;;  %v1958_v52 = vld [vmem:[%s2619_s7] ss:$0 sm:$0xff] }
 0x19e   : > { %v1364_v1 = vsel %vm1362_vm7, %v1347_v33, %v1305_v0 }
 0x19f   : > { %1823 = vmatmul.msk.bf16.vlgmr.msra.gmra.mxu1 %vm454_vm0, %v1364_v1 }
 0x1a5   : > { %1829 = vmatmul.msk.bf16.gmra.mxu2 %vm454_vm0, %v1376_v2 }
 0x1b5   : > { %1830 = vmatmul.msk.bf16.gmra.mxu2 %vm454_vm0, %v1378_v57 }
 0x1d8   : > { %v1445_v4 = vpop.f32.mrf.mxu2 }
 0x1d9   : > { %v1446_v6 = vadd.f32 %v1957_v5, %v1445_v4 }
 0x1db   : > { %v1482_v13 = vmax.f32 %v1446_v6, 0.0 }
 0x1e0   : > { %v1447_v9 = vpop.f32.mrf.mxu2 }
 0x1e1   : > { %v1448_v12 = vadd.f32 %v1957_v5, %v1447_v9 }
 0x1e3   : > { %v1483_v18 = vmax.f32 %v1448_v12, 0.0 }
 0x1e5   : > { %v1497_v19 = vpack.c.bf16 %v1483_v18, %v1482_v13 }
 0x1e7   : > { %1848 = vmatmul.msk.bf16.vlgmr.msra.gmra.mxu3 %vm454_vm0, %v1497_v19 }
 0x1e8   : > { %v1450_v29 = vpop.f32.mrf.mxu2 }
 0x1e9   : > { %v1451_v11 = vadd.f32 %v1957_v5, %v1450_v29 }
 0x1eb   : > { %v1484_v24 = vmax.f32 %v1451_v11, 0.0 }
 0x1f0   : > { %v1452_v17 = vpop.f32.mrf.mxu2 }
 0x1f1   : > { %v1453_v10 = vadd.f32 %v1957_v5, %v1452_v17 }
 0x1f3   : > { %v1485_v40 = vmax.f32 %v1453_v10, 0.0 }
 0x1f5   : > { %v1498_v26 = vpack.c.bf16 %v1485_v40, %v1484_v24 }
 0x1f7   : > { %1849 = vmatmul.msk.bf16.gmra.mxu3 %vm454_vm0, %v1498_v26 }
 0x1f8   : > { %v1455_v3 = vpop.f32.mrf.mxu2 }
 0x1f9   : > { %v1456_v31 = vadd.f32 %v1957_v5, %v1455_v3 }
 0x1fb   : > { %v1486_v35 = vmax.f32 %v1456_v31, 0.0 }
 0x200   : > { %v1457_v32 = vpop.f32.mrf.mxu2 }
 0x201   : > { %v1458_v16 = vadd.f32 %v1957_v5, %v1457_v32 }
 0x203   : > { %v1487_v27 = vmax.f32 %v1458_v16, 0.0 }
 0x205   : > { %v1499_v36 = vpack.c.bf16 %v1487_v27, %v1486_v35 }
 0x207   : > { %1850 = vmatmul.msk.bf16.gmra.mxu3 %vm454_vm0, %v1499_v36 }
 0x208   : > { %v1460_v38 = vpop.f32.mrf.mxu2 }
 0x209   : > { %v1461_v42 = vadd.f32 %v1957_v5, %v1460_v38 }
 0x20b   : > { %v1488_v15 = vmax.f32 %v1461_v42, 0.0 }
 0x210   : > { %v1462_v23 = vpop.f32.mrf.mxu2 }
 0x211   : > { %v1463_v21 = vadd.f32 %v1957_v5, %v1462_v23 }
 0x213   : > { %v1489_v25 = vmax.f32 %v1463_v21, 0.0 }
 0x215   : > { %v1500_v58 = vpack.c.bf16 %v1489_v25, %v1488_v15 }
 0x217   : > { %1851 = vmatmul.msk.bf16.gmra.mxu3 %vm454_vm0, %v1500_v58 }
 0x218   : > { %v1465_v37 = vpop.f32.mrf.mxu2 }
 0x219   : > { %v1466_v63 = vadd.f32 %v1957_v5, %v1465_v37 }
 0x21b   : > { %v1490_v39 = vmax.f32 %v1466_v63, 0.0 }
 0x21c   : > { %v1440_v8 = vpop.f32.mrf.mxu1 }
 0x21d   : > { %v1441_v43 = vadd.f32 %v1957_v5, %v1440_v8 }
 0x21f   : > { %v1480_v59 = vmax.f32 %v1441_v43, 0.0 }
 0x220   : > { %v1467_v7 = vpop.f32.mrf.mxu2 }
 0x221   : > { %v1468_v41 = vadd.f32 %v1957_v5, %v1467_v7 }
 0x223   : > { %v1491_v44 = vmax.f32 %v1468_v41, 0.0 }
 0x224   : > { %v1442_v46 = vpop.f32.mrf.mxu1 }
 0x225   : > { %v1501_v54 = vpack.c.bf16 %v1491_v44, %v1490_v39  ;;  %v1443_v45 = vadd.f32 %v1957_v5, %v1442_v46 }
 0x227   : > { %v1481_v48 = vmax.f32 %v1443_v45, 0.0  ;;  %1852 = vmatmul.msk.bf16.gmra.mxu3 %vm454_vm0, %v1501_v54 }
 0x228   : > { %v1470_v51 = vpop.f32.mrf.mxu2 }
 0x229   : > { %v1496_v49 = vpack.c.bf16 %v1481_v48, %v1480_v59  ;;  %v1471_v53 = vadd.f32 %v1957_v5, %v1470_v51 }
 0x22b   : > { %1847 = vmatmul.msk.bf16.vlgmr.msrb.gmra.mxu1 %vm454_vm0, %v1496_v49  ;;  %v1492_v47 = vmax.f32 %v1471_v53, 0.0 }
 0x230   : > { %v1472_v50 = vpop.f32.mrf.mxu2 }
 0x231   : > { %v1473_v34 = vadd.f32 %v1957_v5, %v1472_v50 }
 0x233   : > { %v1493_v56 = vmax.f32 %v1473_v34, 0.0 }
 0x235   : > { %v1502_v61 = vpack.c.bf16 %v1493_v56, %v1492_v47 }
 0x237   : > { %1853 = vmatmul.msk.bf16.gmra.mxu3 %vm454_vm0, %v1502_v61 }
 0x238   : > { %v1475_v55 = vpop.f32.mrf.mxu2 }
 0x239   : > { %v1476_v0 = vadd.f32 %v1957_v5, %v1475_v55 }
 0x23b   : > { %v1494_v1 = vmax.f32 %v1476_v0, 0.0 }
 0x240   : > { %v1477_v33 = vpop.f32.mrf.mxu2 }
 0x241   : > { %v1478_v30 = vadd.f32 %v1957_v5, %v1477_v33 }
 0x243   : > { %v1495_v62 = vmax.f32 %v1478_v30, 0.0 }
 0x245   : > { %v1503_v2 = vpack.c.bf16 %v1495_v62, %v1494_v1 }
 0x247   : > { %1854 = vmatmul.msk.bf16.gmra.mxu3 %vm454_vm0, %v1503_v2 }
 0x26a   : > { %v1578_v22 = vpop.f32.mrf.mxu3 }
 0x26b   : > { %v1579_v57 = vadd.f32 %v1958_v52, %v1578_v22 }
 0x26d   : > { %v1615_v28 = vmax.f32 %v1579_v57, 0.0 }
 0x272   : > { %v1580_v14 = vpop.f32.mrf.mxu3 }
 0x273   : > { %v1581_v60 = vadd.f32 %v1958_v52, %v1580_v14 }
 0x275   : > { %v1616_v20 = vmax.f32 %v1581_v60, 0.0 }
 0x277   : > { %v1892_v4 = vpack.c.bf16 %v1616_v20, %v1615_v28 }
 0x279   : > { %1924 = vst [vmem:[%s2599_s28 + $0x8] sm:$0xff] %v1892_v4  }
 0x27a   : > { %v1583_v5 = vpop.f32.mrf.mxu3 }
 0x27b   : > { %v1584_v6 = vadd.f32 %v1958_v52, %v1583_v5 }
 0x27d   : > { %v1617_v13 = vmax.f32 %v1584_v6, 0.0 }
 0x282   : > { %v1585_v9 = vpop.f32.mrf.mxu3 }
 0x283   : > { %v1586_v12 = vadd.f32 %v1958_v52, %v1585_v9 }
 0x285   : > { %v1618_v18 = vmax.f32 %v1586_v12, 0.0 }
 0x287   : > { %v1897_v19 = vpack.c.bf16 %v1618_v18, %v1617_v13 }
 0x289   : > { %1925 = vst [vmem:[%s2599_s28 + $0x10] sm:$0xff] %v1897_v19  }
 0x28a   : > { %v1588_v29 = vpop.f32.mrf.mxu3 }
 0x28b   : > { %v1589_v11 = vadd.f32 %v1958_v52, %v1588_v29 }
 0x28d   : > { %v1619_v24 = vmax.f32 %v1589_v11, 0.0 }
 0x292   : > { %v1590_v17 = vpop.f32.mrf.mxu3 }
 0x293   : > { %v1591_v10 = vadd.f32 %v1958_v52, %v1590_v17 }
 0x295   : > { %v1620_v40 = vmax.f32 %v1591_v10, 0.0 }
 0x297   : > { %v1902_v26 = vpack.c.bf16 %v1620_v40, %v1619_v24 }
 0x299   : > { %1926 = vst [vmem:[%s2599_s28 + $0x18] sm:$0xff] %v1902_v26  }
 0x29a   : > { %v1593_v3 = vpop.f32.mrf.mxu3 }
 0x29b   : > { %v1594_v31 = vadd.f32 %v1958_v52, %v1593_v3 }
 0x29d   : > { %v1621_v35 = vmax.f32 %v1594_v31, 0.0 }
 0x2a2   : > { %v1595_v32 = vpop.f32.mrf.mxu3 }
 0x2a3   : > { %v1596_v16 = vadd.f32 %v1958_v52, %v1595_v32 }
 0x2a5   : > { %v1622_v27 = vmax.f32 %v1596_v16, 0.0 }
 0x2a7   : > { %v1907_v36 = vpack.c.bf16 %v1622_v27, %v1621_v35 }
 0x2a8   : > { %v1573_v38 = vpop.f32.mrf.mxu1 }
 0x2a9   : > { %1927 = vst [vmem:[%s2599_s28 + $0x20] sm:$0xff] %v1907_v36   ;;  %v1574_v23 = vadd.f32 %v1958_v52, %v1573_v38 }
 0x2aa   : > { %v1598_v42 = vpop.f32.mrf.mxu3 }
 0x2ab   : > { %v1599_v15 = vadd.f32 %v1958_v52, %v1598_v42  ;;  %v1613_v37 = vmax.f32 %v1574_v23, 0.0 }
 0x2ad   : > { %v1623_v7 = vmax.f32 %v1599_v15, 0.0 }
 0x2b0   : > { %v1575_v21 = vpop.f32.mrf.mxu1 }
 0x2b1   : > { %v1576_v25 = vadd.f32 %v1958_v52, %v1575_v21 }
 0x2b2   : > { %v1600_v58 = vpop.f32.mrf.mxu3 }
 0x2b3   : > { %v1614_v8 = vmax.f32 %v1576_v25, 0.0  ;;  %v1601_v63 = vadd.f32 %v1958_v52, %v1600_v58 }
 0x2b5   : > { %v1887_v41 = vpack.c.bf16 %v1614_v8, %v1613_v37  ;;  %v1624_v39 = vmax.f32 %v1601_v63, 0.0 }
 0x2b7   : > { %1888 = vst [vmem:[%s2599_s28] sm:$0xff] %v1887_v41   ;;  %v1912_v43 = vpack.c.bf16 %v1624_v39, %v1623_v7 }
 0x2b9   : > { %1928 = vst [vmem:[%s2599_s28 + $0x28] sm:$0xff] %v1912_v43  }
 0x2ba   : > { %v1603_v44 = vpop.f32.mrf.mxu3 }
 0x2bb   : > { %v1604_v46 = vadd.f32 %v1958_v52, %v1603_v44 }
 0x2bd   : > { %v1625_v59 = vmax.f32 %v1604_v46, 0.0 }
 0x2c2   : > { %v1605_v54 = vpop.f32.mrf.mxu3 }
 0x2c3   : > { %v1606_v45 = vadd.f32 %v1958_v52, %v1605_v54 }
 0x2c5   : > { %v1626_v48 = vmax.f32 %v1606_v45, 0.0 }
 0x2c7   : > { %v1917_v51 = vpack.c.bf16 %v1626_v48, %v1625_v59 }
 0x2c9   : > { %1929 = vst [vmem:[%s2599_s28 + $0x30] sm:$0xff] %v1917_v51  }
 0x2ca   : > { %v1608_v49 = vpop.f32.mrf.mxu3 }
 0x2cb   : > { %v1609_v53 = vadd.f32 %v1958_v52, %v1608_v49 }
 0x2cd   : > { %v1627_v47 = vmax.f32 %v1609_v53, 0.0 }
 0x2d2   : > { %v1610_v50 = vpop.f32.mrf.mxu3 }
 0x2d3   : > { %v1611_v34 = vadd.f32 %v1958_v52, %v1610_v50 }
 0x2d5   : > { %v1628_v56 = vmax.f32 %v1611_v34, 0.0 }
 0x2d7   : > { %v1922_v61 = vpack.c.bf16 %v1628_v56, %v1627_v47 }
 0x2d9   : > { %1930 = vst [vmem:[%s2599_s28 + $0x38] sm:$0xff] %v1922_v61  }
 0x2da PF: > { %s18_s27 = sadd.s32 1, %s1965_s27  }
 0x2db   : > { %p15_p10 = scmp.ge.s32.totalorder %s18_s27, 6  }
 0x2dd   :  { %17 = sbr.rel (!%p15_p10) target bundleno = 1 (0x1), region = 85 }

</bundles_post_ra>
